<compile_context>
chip_gen: v7x
topology: tpu7x:2x2x1
jax: 0.10.0
libtpu: 0.0.40
codegen_flags: <defaults>
</compile_context>

<pallas_src>
import functools

import jax
import jax.numpy as jnp
from jax.experimental import pallas as pl
from jax.experimental.pallas import tpu as pltpu


_VMEM_BUDGET = 40 * 1024 * 1024   # per-tile working-set cap (headroom on v7x's 64 MiB)
_VMEM_LIMIT = 48 * 1024 * 1024    # explicit scoped-VMEM limit (> default, < v7x physical)


def _round_up(x, m):
    return (x + m - 1) // m * m


def _choose_batch_tile(B, S_pad, D, Lp, Fp, max_fs, act_itemsize, batch_tile):
    """Largest batch tile (multiple of 8) whose VMEM working set fits the budget.

    Prefers >= 2 grid steps when the batch allows it, so the activation DMA
    actually pipelines and v7x's two TensorCores both get work.
    """
    # Weight-class blocks (constant index_map) still get default 2-deep buffering.
    # (pl.Buffered(1) on those specs would halve this; left as a further option.)
    fixed = 2 * (max_fs * D * Fp * act_itemsize + Lp * Fp * 4 + Fp * 4)
    tb = max(8, _round_up(min(batch_tile, B), 8))
    if _round_up(B, 8) >= 16:
        tb = min(tb, max(8, (_round_up(B, 8) // 2) // 8 * 8))
    while tb > 8:
        per_tile = (2 * tb * S_pad * D * act_itemsize   # double-buffered activation block
                    + 2 * tb * Lp * Fp * 4              # f32 conv accumulator + matmul temp
                    + 2 * tb * Lp * D * act_itemsize    # shifted-tap temporaries
                    + 2 * tb * Fp * 4)                  # double-buffered pooled output
        if fixed + per_tile <= _VMEM_BUDGET:
            break
        tb -= 8
    return tb
    # TODO(synk): for very long sequences, add a time-axis grid dimension with a
    # running-max accumulator (pl.when init/finalize) instead of shrinking TB.


def make_textcnn_kernel(max_fs):
    """Kernel over one batch tile.

    refs: emb [TB, S_pad, D], w_taps [max_fs, D, Fp], b_conv [1, Fp],
          mask [Lp, Fp], out [TB, Fp]  (pooled features, pre-FC)
    """

    def kernel(emb_ref, wtap_ref, bconv_ref, mask_ref, out_ref):
        TB, _, D = emb_ref.shape
        Lp, Fp = mask_ref.shape

        emb = emb_ref[...]                                    # [TB, S_pad, D]

        # Seed the conv accumulator with the validity mask: invalid time
        # positions (per filter-size column group) start at -1e30 (f32), so the
        # later max over time ignores them.  This folds the mask add into the
        # accumulation instead of a separate VALU pass.
        acc = jnp.broadcast_to(mask_ref[...][None, :, :], (TB, Lp, Fp))
        acc = acc.reshape(TB * Lp, Fp)                        # f32

        # One accumulate-matmul per tap (K = D, no per-tap zero padding of K,
        # no im2col copy).  Static unrolled loop; f32 MXU accumulation.
        for k in range(max_fs):
            tap = emb[:, k:k + Lp, :].reshape(TB * Lp, D)     # lane dim = D
            acc = acc + jnp.dot(tap, wtap_ref[k],
                                preferred_element_type=jnp.float32)

        conv = acc.reshape(TB, Lp, Fp)
        # Max-pool over time first, then bias + ReLU (monotone => commutes):
        # epilogue work is O(TB*Fp), all in f32 (v5e has no bf16 VPU).
        pooled = jnp.max(conv, axis=1)                        # [TB, Fp]
        pooled = jnp.maximum(pooled + bconv_ref[...], 0.0)
        # Dropout is identity in eval mode.
        out_ref[...] = pooled.astype(out_ref.dtype)

    return kernel


def textcnn_forward(x_tokens, params, filter_sizes, *,
                    batch_tile=64, compute_dtype=jnp.float32):
    """x_tokens: [seq, batch] int32 tokens (PyTorch convention). Eval-mode forward."""
    filter_sizes = tuple(int(fs) for fs in filter_sizes)
    n_fs = len(filter_sizes)
    max_fs = max(filter_sizes)
    min_fs = min(filter_sizes)

    emb_table = params["embedding"]                 # [vocab, D]
    D = emb_table.shape[1]
    n_filters = params["conv0_w"].shape[-1]
    out_dim = params["fc_w"].shape[-1]

    S, B = x_tokens.shape
    L = S - min_fs + 1                              # most positions any filter needs
    Lp = _round_up(L, 8)                            # sublane-aligned time axis
    S_pad = _round_up(Lp + max_fs - 1, 8)           # sublane-aligned, covers all taps
    Fp = _round_up(n_fs * n_filters, 128)           # lane-dense pooled features
    act_itemsize = jnp.dtype(compute_dtype).itemsize

    TB = _choose_batch_tile(B, S_pad, D, Lp, Fp, max_fs, act_itemsize, batch_tile)
    Bp = _round_up(B, TB)

    # ---- JAX-side glue: permute + embedding gather, pad batch/time only (D untouched). ----
    # TODO(synk): the embedding gather could be fused into the kernel with
    # PrefetchScalarGridSpec scalar-prefetched token ids + per-row DMA from an
    # HBM (memory_space=pl.ANY) table; kept in the wrapper here.
    x_bt = jnp.transpose(x_tokens, (1, 0))          # [B, S]
    emb = emb_table[x_bt].astype(compute_dtype)     # [B, S, D]
    emb = jnp.pad(emb, ((0, Bp - B), (0, S_pad - S), (0, 0)))

    # ---- Pack per-tap conv weights / bias / validity mask (host prep). ----
    w_taps = jnp.zeros((max_fs, D, Fp), compute_dtype)
    b_packed = jnp.zeros((1, Fp), jnp.float32)
    mask = jnp.zeros((Lp, Fp), jnp.float32)         # f32 so -1e30 is exact (not -inf)
    pos = jnp.arange(Lp)[:, None]                   # [Lp, 1]
    for i, fs in enumerate(filter_sizes):
        w = params[f"conv{i}_w"].astype(compute_dtype)   # [fs, D, F]
        b = params[f"conv{i}_b"]                         # [1, F]
        c0, c1 = i * n_filters, (i + 1) * n_filters
        w_taps = w_taps.at[:fs, :, c0:c1].set(w)         # taps k >= fs stay zero
        b_packed = b_packed.at[:, c0:c1].set(b)
        # Positions l > S - fs are not valid conv outputs for this filter size.
        # NOTE: if S < fs, every position is masked and the feature becomes
        # ReLU(b - 1e30) = 0 instead of erroring like PyTorch.
        col_mask = jnp.where(pos <= (S - fs), 0.0, -1e30)
        mask = mask.at[:, c0:c1].set(jnp.broadcast_to(col_mask, (Lp, n_filters)))

    kernel = make_textcnn_kernel(max_fs)

    cost = pl.CostEstimate(
        flops=2 * Bp * Lp * max_fs * D * Fp,
        transcendentals=0,
        bytes_accessed=(Bp * S_pad * D + max_fs * D * Fp) * act_itemsize
                       + (Lp * Fp + Fp) * 4 + Bp * Fp * 4,
    )

    pooled_padded = pl.pallas_call(
        kernel,
        out_shape=jax.ShapeDtypeStruct((Bp, Fp), jnp.float32),
        grid=(Bp // TB,),
        in_specs=[
            # Activations: pipelined (double-buffered) over the batch grid;
            # last dim kept at native D (== full array dim, legal BlockSpec).
            pl.BlockSpec((TB, S_pad, D), lambda b: (b, 0, 0)),
            # Weights / bias / mask: constant index_map -> fetched once, resident.
            pl.BlockSpec((max_fs, D, Fp), lambda b: (0, 0, 0)),
            pl.BlockSpec((1, Fp), lambda b: (0, 0)),
            pl.BlockSpec((Lp, Fp), lambda b: (0, 0)),
        ],
        out_specs=pl.BlockSpec((TB, Fp), lambda b: (b, 0)),   # lane-dense output
        compiler_params=pltpu.CompilerParams(
            dimension_semantics=("parallel",),      # v7x: 2 TCs split batch tiles
            vmem_limit_bytes=_VMEM_LIMIT),
        cost_estimate=cost,
    )(emb, w_taps, b_packed, mask)

    # Final Linear on the valid slice as a plain full-batch XLA matmul:
    # out_dim is tiny, so fusing it per-tile was pure MXU fill/drain overhead.
    pooled = pooled_padded[:B, :n_fs * n_filters]             # [B, n_fs*n_filters] f32
    return pooled @ params["fc_w"].astype(jnp.float32) + params["fc_b"]


def reference_forward(x_tokens, params, filter_sizes):
    """Pure-JAX reference mirroring the PyTorch module (eval mode)."""
    x_bt = jnp.transpose(x_tokens, (1, 0))
    emb = params["embedding"][x_bt]              # [B, S, D]
    pooled = []
    for i, fs in enumerate(filter_sizes):
        w = params[f"conv{i}_w"]                 # [fs, D, F]
        b = params[f"conv{i}_b"][0]              # [F]
        S = emb.shape[1]
        Lv = S - fs + 1
        acc = jnp.zeros((emb.shape[0], Lv, w.shape[-1]), jnp.float32)
        for k in range(fs):
            acc = acc + jnp.einsum("bld,df->blf", emb[:, k:k + Lv, :], w[k])
        acc = jax.nn.relu(acc + b[None, None, :])
        pooled.append(jnp.max(acc, axis=1))
    cat = jnp.concatenate(pooled, axis=1)
    return cat @ params["fc_w"] + params["fc_b"][0]


def init_params(key, vocab_size, embedding_dim, n_filters, filter_sizes, output_dim):
    keys = jax.random.split(key, 2 + 2 * len(filter_sizes) + 2)
    params = {}
    params["embedding"] = 0.1 * jax.random.normal(
        keys[0], (vocab_size, embedding_dim), jnp.float32)
    for i, fs in enumerate(filter_sizes):
        params[f"conv{i}_w"] = 0.1 * jax.random.normal(
            keys[1 + 2 * i], (fs, embedding_dim, n_filters), jnp.float32)
        params[f"conv{i}_b"] = 0.1 * jax.random.normal(
            keys[2 + 2 * i], (1, n_filters), jnp.float32)
    in_dim = len(filter_sizes) * n_filters
    params["fc_w"] = 0.1 * jax.random.normal(
        keys[-2], (in_dim, output_dim), jnp.float32)
    params["fc_b"] = 0.1 * jax.random.normal(
        keys[-1], (1, output_dim), jnp.float32)
    return params


if __name__ == "__main__":
    # Small, module-consistent shapes.
    vocab_size = 50
    embedding_dim = 32
    n_filters = 8
    filter_sizes = (2, 3, 4)
    output_dim = 4
    seq_len = 16
    batch = 2
    # TODO(synk): nn.Dropout is a no-op in eval mode; training-mode dropout not implemented.
    # Note: pass compute_dtype=jnp.bfloat16 on v6e/v7x for full-rate bf16 MXU and
    # half the activation DMA / VMEM (loosens tolerance to ~1e-2); epilogue and
    # accumulation stay f32 either way.  f32 here keeps the self-check tight.

    key = jax.random.PRNGKey(0)
    pkey, xkey = jax.random.split(key)
    params = init_params(pkey, vocab_size, embedding_dim, n_filters,
                         filter_sizes, output_dim)

    # PyTorch-convention input: [seq_len, batch] of token ids.
    x = jax.random.randint(xkey, (seq_len, batch), 0, vocab_size, dtype=jnp.int32)

    fwd = jax.jit(functools.partial(textcnn_forward, filter_sizes=filter_sizes))
    out = fwd(x, params)
    jax.block_until_ready(out)

    ref = reference_forward(x, params, filter_sizes)
    assert out.shape == (batch, output_dim)
    assert jnp.allclose(out, ref, atol=1e-4, rtol=1e-4), float(jnp.max(jnp.abs(out - ref)))

    print("KERNEL_OK")
</pallas_src>

<mosaic_0001>
module attributes {stable_mosaic.version = 11 : i64} {
  func.func @kernel(%arg0: i32, %arg1: memref<8x24x32xf32, #tpu.memory_space<vmem>>, %arg2: memref<4x32x128xf32, #tpu.memory_space<vmem>>, %arg3: memref<1x128xf32, #tpu.memory_space<vmem>>, %arg4: memref<16x128xf32, #tpu.memory_space<vmem>>, %arg5: memref<8x128xf32, #tpu.memory_space<vmem>>) attributes {dimension_semantics = [#tpu.dimension_semantics<parallel>], iteration_bounds = array<i64: 1>, scalar_prefetch = 0 : i64, scratch_operands = 0 : i64, tpu.core_type = #tpu.core_type<tc>, window_params = [{transform_indices = @transform_0, window_bounds = array<i64: 8, 24, 32>}, {pipeline_mode = #tpu.pipeline_mode<synchronous>, transform_indices = @transform_1, window_bounds = array<i64: 4, 32, 128>}, {pipeline_mode = #tpu.pipeline_mode<synchronous>, transform_indices = @transform_2, window_bounds = array<i64: 1, 128>}, {pipeline_mode = #tpu.pipeline_mode<synchronous>, transform_indices = @transform_3, window_bounds = array<i64: 16, 128>}, {transform_indices = @transform_4, window_bounds = array<i64: 8, 128>}]} {
    %c0 = arith.constant 0 : index
    %c0_0 = arith.constant 0 : index
    %c0_1 = arith.constant 0 : index
    %0 = vector.load %arg1[%c0, %c0_0, %c0_1] : memref<8x24x32xf32, #tpu.memory_space<vmem>>, vector<8x24x32xf32>
    %c0_2 = arith.constant 0 : index
    %c0_3 = arith.constant 0 : index
    %1 = vector.load %arg4[%c0_2, %c0_3] : memref<16x128xf32, #tpu.memory_space<vmem>>, vector<16x128xf32>
    %2 = vector.shape_cast %1 : vector<16x128xf32> to vector<1x16x128xf32>
    %3 = vector.shape_cast %2 : vector<1x16x128xf32> to vector<1x16x128xf32>
    %4 = vector.broadcast %3 : vector<1x16x128xf32> to vector<8x16x128xf32>
    %5 = vector.shape_cast %4 : vector<8x16x128xf32> to vector<128x128xf32>
    %6 = vector.extract_strided_slice %0 {offsets = [0, 0, 0], sizes = [8, 16, 32], strides = [1, 1, 1]} : vector<8x24x32xf32> to vector<8x16x32xf32>
    %7 = vector.shape_cast %6 : vector<8x16x32xf32> to vector<128x32xf32>
    %c0_4 = arith.constant 0 : index
    %c0_5 = arith.constant 0 : index
    %c0_6 = arith.constant 0 : index
    %8 = vector.load %arg2[%c0_4, %c0_5, %c0_6] : memref<4x32x128xf32, #tpu.memory_space<vmem>>, vector<1x32x128xf32>
    %9 = vector.shape_cast %8 : vector<1x32x128xf32> to vector<32x128xf32>
    %cst = arith.constant dense<0.000000e+00> : vector<128x128xf32>
    %10 = tpu.matmul %7, %9, %cst {dimension_numbers = #tpu.dot_dimension_numbers<[1], [0], [0], [1], [0, 0, 1, 1], [], []>} : vector<128x32xf32>, vector<32x128xf32>, vector<128x128xf32> -> vector<128x128xf32>
    %11 = arith.addf %5, %10 : vector<128x128xf32>
    %12 = vector.extract_strided_slice %0 {offsets = [0, 1, 0], sizes = [8, 16, 32], strides = [1, 1, 1]} : vector<8x24x32xf32> to vector<8x16x32xf32>
    %13 = vector.shape_cast %12 : vector<8x16x32xf32> to vector<128x32xf32>
    %c1 = arith.constant 1 : index
    %c0_7 = arith.constant 0 : index
    %c0_8 = arith.constant 0 : index
    %14 = vector.load %arg2[%c1, %c0_7, %c0_8] : memref<4x32x128xf32, #tpu.memory_space<vmem>>, vector<1x32x128xf32>
    %15 = vector.shape_cast %14 : vector<1x32x128xf32> to vector<32x128xf32>
    %cst_9 = arith.constant dense<0.000000e+00> : vector<128x128xf32>
    %16 = tpu.matmul %13, %15, %cst_9 {dimension_numbers = #tpu.dot_dimension_numbers<[1], [0], [0], [1], [0, 0, 1, 1], [], []>} : vector<128x32xf32>, vector<32x128xf32>, vector<128x128xf32> -> vector<128x128xf32>
    %17 = arith.addf %11, %16 : vector<128x128xf32>
    %18 = vector.extract_strided_slice %0 {offsets = [0, 2, 0], sizes = [8, 16, 32], strides = [1, 1, 1]} : vector<8x24x32xf32> to vector<8x16x32xf32>
    %19 = vector.shape_cast %18 : vector<8x16x32xf32> to vector<128x32xf32>
    %c2 = arith.constant 2 : index
    %c0_10 = arith.constant 0 : index
    %c0_11 = arith.constant 0 : index
    %20 = vector.load %arg2[%c2, %c0_10, %c0_11] : memref<4x32x128xf32, #tpu.memory_space<vmem>>, vector<1x32x128xf32>
    %21 = vector.shape_cast %20 : vector<1x32x128xf32> to vector<32x128xf32>
    %cst_12 = arith.constant dense<0.000000e+00> : vector<128x128xf32>
    %22 = tpu.matmul %19, %21, %cst_12 {dimension_numbers = #tpu.dot_dimension_numbers<[1], [0], [0], [1], [0, 0, 1, 1], [], []>} : vector<128x32xf32>, vector<32x128xf32>, vector<128x128xf32> -> vector<128x128xf32>
    %23 = arith.addf %17, %22 : vector<128x128xf32>
    %24 = vector.extract_strided_slice %0 {offsets = [0, 3, 0], sizes = [8, 16, 32], strides = [1, 1, 1]} : vector<8x24x32xf32> to vector<8x16x32xf32>
    %25 = vector.shape_cast %24 : vector<8x16x32xf32> to vector<128x32xf32>
    %c3 = arith.constant 3 : index
    %c0_13 = arith.constant 0 : index
    %c0_14 = arith.constant 0 : index
    %26 = vector.load %arg2[%c3, %c0_13, %c0_14] : memref<4x32x128xf32, #tpu.memory_space<vmem>>, vector<1x32x128xf32>
    %27 = vector.shape_cast %26 : vector<1x32x128xf32> to vector<32x128xf32>
    %cst_15 = arith.constant dense<0.000000e+00> : vector<128x128xf32>
    %28 = tpu.matmul %25, %27, %cst_15 {dimension_numbers = #tpu.dot_dimension_numbers<[1], [0], [0], [1], [0, 0, 1, 1], [], []>} : vector<128x32xf32>, vector<32x128xf32>, vector<128x128xf32> -> vector<128x128xf32>
    %29 = arith.addf %23, %28 : vector<128x128xf32>
    %30 = vector.shape_cast %29 : vector<128x128xf32> to vector<8x16x128xf32>
    %cst_16 = arith.constant dense<0xFF800000> : vector<8x128xf32>
    %31 = vector.multi_reduction <maximumf>, %30, %cst_16 [1] : vector<8x16x128xf32> to vector<8x128xf32>
    %c0_17 = arith.constant 0 : index
    %c0_18 = arith.constant 0 : index
    %32 = vector.load %arg3[%c0_17, %c0_18] : memref<1x128xf32, #tpu.memory_space<vmem>>, vector<1x128xf32>
    %33 = vector.broadcast %32 : vector<1x128xf32> to vector<8x128xf32>
    %34 = arith.addf %31, %33 : vector<8x128xf32>
    %cst_19 = arith.constant 0.000000e+00 : f32
    %35 = vector.broadcast %cst_19 : f32 to vector<8x128xf32>
    %36 = arith.maximumf %34, %35 : vector<8x128xf32>
    %c0_20 = arith.constant 0 : index
    %c0_21 = arith.constant 0 : index
    %37 = vector.load %arg5[%c0_20, %c0_21] : memref<8x128xf32, #tpu.memory_space<vmem>>, vector<8x128xf32>
    tpu.vector_store %arg5[%c0_20, %c0_21], %36 {strides = array<i32>} : memref<8x128xf32, #tpu.memory_space<vmem>>, vector<8x128xf32>,
    return
  }
  func.func @transform_0(%arg0: i32) -> (i32, i32, i32) {
    %c0_i32 = arith.constant 0 : i32
    %c0_i32_0 = arith.constant 0 : i32
    %c0_i32_1 = arith.constant 0 : i32
    return %arg0, %c0_i32, %c0_i32_0 : i32, i32, i32
  }
  func.func @transform_1(%arg0: i32) -> (i32, i32, i32) {
    %c0_i32 = arith.constant 0 : i32
    %c0_i32_0 = arith.constant 0 : i32
    %c0_i32_1 = arith.constant 0 : i32
    %c0_i32_2 = arith.constant 0 : i32
    return %c0_i32, %c0_i32_0, %c0_i32_1 : i32, i32, i32
  }
  func.func @transform_2(%arg0: i32) -> (i32, i32) {
    %c0_i32 = arith.constant 0 : i32
    %c0_i32_0 = arith.constant 0 : i32
    %c0_i32_1 = arith.constant 0 : i32
    return %c0_i32, %c0_i32_0 : i32, i32
  }
  func.func @transform_3(%arg0: i32) -> (i32, i32) {
    %c0_i32 = arith.constant 0 : i32
    %c0_i32_0 = arith.constant 0 : i32
    %c0_i32_1 = arith.constant 0 : i32
    return %c0_i32, %c0_i32_0 : i32, i32
  }
  func.func @transform_4(%arg0: i32) -> (i32, i32) {
    %c0_i32 = arith.constant 0 : i32
    %c0_i32_0 = arith.constant 0 : i32
    return %arg0, %c0_i32 : i32, i32
  }
}

</mosaic_0001>

<bundles_post_ra>
// kernel: textcnn_forward.1
= control target key start
LH: loop header
LB: loop body
LE: loop exit
PB: predicated region body
PF: predicated region fallthrough
CT: control target
= control target key end

     0   :  { %vm47_vm0 = vcmask 261120   ;;  %vm504_vm1 = vcmask 1045504   ;;  %vm265_vm2 = vcmask 1046528   ;;  %vm743_vm3 = vcmask 1044480   ;;  %s1914_s1 = inlined_call_operand.vmem [shape: f32[4,32,128], index: 1, kind: input, shape index: {}]   ;;  %s1915_s0 = inlined_call_operand.vmem [shape: f32[8,24,32], index: 0, kind: input, shape index: {}]   ;;  %s1916_s3 = inlined_call_operand.vmem [shape: f32[16,128], index: 3, kind: input, shape index: {}]   ;;  %s1917_s2 = inlined_call_operand.vmem [shape: f32[1,128], index: 2, kind: input, shape index: {}]   ;;  %s1918_s4 = inlined_call_operand.vmem [shape: f32[8,128], index: 4, kind: output, shape index: {}]  }
   0x1   :  { %v43_v0 = vld [vmem:[%s1914_s1] sm:$0xff]  ;;  %v44_v1 = vld [vmem:[%s1914_s1 + $0x8] sm:$0xff]  ;;  %v45_v5 = vld [vmem:[%s1914_s1 + $0x10] sm:$0xff]  ;;  %vm1070_vm4 = vcmask 1041409   ;;  %vm1073_vm5 = vcmask 1042434   ;;  %vm1076_vm6 = vcmask 1043459  }
   0x2   :  { %v1132_v2 = vld [vmem:[%s1914_s1 + $0x40] sm:$0xff]  ;;  %v1381_v3 = vpack.c.bf16 %v44_v1, %v43_v0  ;;  %v1133_v4 = vld [vmem:[%s1914_s1 + $0x48] sm:$0xff]  ;;  %v46_v6 = vld [vmem:[%s1914_s1 + $0x18] sm:$0xff]  ;;  %vm1079_vm7 = vcmask 1044484   ;;  %vm1082_vm8 = vcmask 1045509   ;;  %vm1085_vm9 = vcmask 1046534  }
   0x3   :  { %v1397_v7 = vpack.c.bf16 %v1133_v4, %v1132_v2  ;;  %v1385_v8 = vpack.c.bf16 %v46_v6, %v45_v5  ;;  %v1134_v9 = vld [vmem:[%s1914_s1 + $0x50] sm:$0xff]  ;;  %v1135_v10 = vld [vmem:[%s1914_s1 + $0x58] sm:$0xff]  ;;  %v1529_v11 = vld [vmem:[%s1915_s0] sm:$0xff]  ;;  %vm1088_vm10 = vcmask 1047559  }
   0x4   :  { %1382 = vmatprep.subr.bf16.mxu1 %v1381_v3  ;;  %v1401_v12 = vpack.c.bf16 %v1135_v10, %v1134_v9  ;;  %1261 = vmatprep.mubr.msk.f32.mxu1 %vm47_vm0, %v1529_v11  ;;  %v1536_v13 = vld [vmem:[%s1915_s0 + $0x8] sm:$0xff]  ;;  %v505_v14 = vrot.slane %v1529_v11, 2  ;;  %v1112_v15 = vld [vmem:[%s1914_s1 + $0x20] sm:$0xff]  ;;  %v1549_v18 = vld [vmem:[%s1915_s0 + $0x10] sm:$0xff] }
   0x5   :  { %v1113_v16 = vld [vmem:[%s1914_s1 + $0x28] sm:$0xff]  ;;  %1398 = vmatprep.subr.bf16.mxu0 %v1397_v7  ;;  %1384 = vmatpush3.bf16.msra.mxu1 %v1381_v3  ;;  %v506_v17 = vrot.slane %v1536_v13, 2  ;;  %v1152_v19 = vld [vmem:[%s1914_s1 + $0x60] sm:$0xff]  ;;  %v508_v22 = vrot.slane %v1549_v18, 2  ;;  %v1561_v23 = vld [vmem:[%s1915_s0 + $0x18] sm:$0xff] }
   0x6   :  { %v1153_v20 = vld [vmem:[%s1914_s1 + $0x68] sm:$0xff]  ;;  %1400 = vmatpush3.bf16.msra.mxu0 %v1397_v7  ;;  %1386 = vmatprep.subr.bf16.mxu1 %v1385_v8  ;;  %v1389_v21 = vpack.c.bf16 %v1113_v16, %v1112_v15  ;;  %v1566_v24 = vld [vmem:[%s1915_s0 + $0x20] sm:$0xff]  ;;  %v510_v27 = vrot.slane %v1561_v23, 2  ;;  %v1580_v30 = vld [vmem:[%s1915_s0 + $0x30] sm:$0xff] }
   0x7   :  { %1402 = vmatprep.subr.bf16.mxu0 %v1401_v12  ;;  %v507_v25 = vsel %vm504_vm1, %v505_v14, %v506_v17  ;;  %v1405_v26 = vpack.c.bf16 %v1153_v20, %v1152_v19  ;;  %v1573_v28 = vld [vmem:[%s1915_s0 + $0x28] sm:$0xff]  ;;  %v511_v29 = vrot.slane %v1566_v24, 2  ;;  %v1585_v31 = vld [vmem:[%s1915_s0 + $0x38] sm:$0xff]  ;;  %v509_v32 = vsel %vm504_vm1, %v506_v17, %v508_v22  ;;  %v1114_v34 = vld [vmem:[%s1914_s1 + $0x30] sm:$0xff] }
   0x8   :  { %1325 = vmatprep.mubr.msk.f32.mxu0 %vm47_vm0, %v507_v25  ;;  %v513_v33 = vrot.slane %v1573_v28, 2  ;;  %v1115_v35 = vld [vmem:[%s1914_s1 + $0x38] sm:$0xff]  ;;  %v515_v37 = vrot.slane %v1580_v30, 2  ;;  %v516_v38 = vrot.slane %v1585_v31, 2  ;;  %v1601_v39 = vld [vmem:[%s1915_s0 + $0x40] sm:$0xff]  ;;  %v1154_v40 = vld [vmem:[%s1914_s1 + $0x70] sm:$0xff] }
   0x9   :  { %1388 = vmatpush3.bf16.msra.mxu1 %v1385_v8  ;;  %v512_v36 = vsel %vm504_vm1, %v510_v27, %v511_v29  ;;  %v1155_v41 = vld [vmem:[%s1914_s1 + $0x78] sm:$0xff]  ;;  %v1614_v42 = vld [vmem:[%s1915_s0 + $0x48] sm:$0xff]  ;;  %v1619_v43 = vld [vmem:[%s1915_s0 + $0x50] sm:$0xff]  ;;  %v1393_v44 = vpack.c.bf16 %v1115_v35, %v1114_v34  ;;  %v518_v46 = vrot.slane %v1601_v39, 2  ;;  %v266_v25 = vrot.slane %v1529_v11, 1 }
   0xa   :  { %1404 = vmatpush3.bf16.msra.mxu0 %v1401_v12  ;;  %1390 = vmatprep.subr.bf16.mxu1 %v1389_v21  ;;  %v514_v45 = vsel %vm504_vm1, %v511_v29, %v513_v33  ;;  %v1409_v47 = vpack.c.bf16 %v1155_v41, %v1154_v40  ;;  %v517_v48 = vsel %vm504_vm1, %v515_v37, %v516_v38  ;;  %v520_v49 = vrot.slane %v1614_v42, 2  ;;  %v1633_v51 = vld [vmem:[%s1915_s0 + $0x58] sm:$0xff]  ;;  %v1640_v52 = vld [vmem:[%s1915_s0 + $0x60] sm:$0xff]  ;;  %v1645_v53 = vld [vmem:[%s1915_s0 + $0x68] sm:$0xff] }
   0xb   :  { %1406 = vmatprep.subr.bf16.mxu0 %v1405_v26  ;;  %v521_v50 = vrot.slane %v1619_v43, 2  ;;  %v519_v54 = vsel %vm504_vm1, %v516_v38, %v518_v46  ;;  %v523_v55 = vrot.slane %v1633_v51, 2  ;;  %v525_v57 = vrot.slane %v1640_v52, 2  ;;  %v1659_v59 = vld [vmem:[%s1915_s0 + $0x70] sm:$0xff]  ;;  %v1666_v60 = vld [vmem:[%s1915_s0 + $0x78] sm:$0xff]  ;;  %v1671_v61 = vld [vmem:[%s1915_s0 + $0x80] sm:$0xff] }
   0xc   :  { %1262 = vmatmul.mubr.msk.f32.vlgmr.msra.gmra.mrb[0].mxu1 %vm47_vm0, %v1536_v13  ;;  %v526_v58 = vrot.slane %v1645_v53, 2  ;;  %v528_v63 = vrot.slane %v1659_v59, 2  ;;  %v530_v1 = vrot.slane %v1666_v60, 2  ;;  %v531_v2 = vrot.slane %v1671_v61, 2  ;;  %v1685_v3 = vld [vmem:[%s1915_s0 + $0x88] sm:$0xff]  ;;  %v1692_v4 = vld [vmem:[%s1915_s0 + $0x90] sm:$0xff] }
   0xd   :  { %1326 = vmatmul.mubr.msk.f32.vlgmr.msra.gmra.mrb[0].mxu0 %vm47_vm0, %v509_v32  ;;  %1392 = vmatpush3.bf16.msra.mxu1 %v1389_v21  ;;  %v522_v56 = vsel %vm504_vm1, %v520_v49, %v521_v50  ;;  %v524_v62 = vsel %vm504_vm1, %v521_v50, %v523_v55  ;;  %v1697_v5 = vld [vmem:[%s1915_s0 + $0x98] sm:$0xff]  ;;  %v533_v7 = vrot.slane %v1685_v3, 2  ;;  %v535_v9 = vrot.slane %v1692_v4, 2  ;;  %v1711_v12 = vld [vmem:[%s1915_s0 + $0xa0] sm:$0xff]  ;;  %v1718_v14 = vld [vmem:[%s1915_s0 + $0xa8] sm:$0xff] }
   0xe   :  { %1264 = vmatprep.mubr.msk.f32.mxu1 %vm47_vm0, %v1561_v23  ;;  %1328 = vmatprep.mubr.msk.f32.mxu0 %vm47_vm0, %v512_v36  ;;  %v527_v0 = vsel %vm504_vm1, %v525_v57, %v526_v58  ;;  %v529_v6 = vsel %vm504_vm1, %v526_v58, %v528_v63  ;;  %v532_v8 = vsel %vm504_vm1, %v530_v1, %v531_v2  ;;  %v536_v10 = vrot.slane %v1697_v5, 2  ;;  %v1723_v15 = vld [vmem:[%s1915_s0 + $0xb0] sm:$0xff]  ;;  %v1737_v22 = vld [vmem:[%s1915_s0 + $0xb8] sm:$0xff] }
   0xf   :  { %1408 = vmatpush3.bf16.msra.mxu0 %v1405_v26  ;;  %1394 = vmatprep.subr.bf16.mxu1 %v1393_v44  ;;  %v534_v16 = vsel %vm504_vm1, %v531_v2, %v533_v7  ;;  %v538_v17 = vrot.slane %v1711_v12, 2  ;;  %v540_v20 = vrot.slane %v1718_v14, 2  ;;  %v541_v21 = vrot.slane %v1723_v15, 2 }
  0x10   :  { %1265 = vmatmul.mubr.msk.f32.gmra.mrb[2].mxu1 %vm47_vm0, %v1566_v24  ;;  %1410 = vmatprep.subr.bf16.mxu0 %v1409_v47  ;;  %v537_v19 = vsel %vm504_vm1, %v535_v9, %v536_v10  ;;  %v543_v27 = vrot.slane %v1737_v22, 2  ;;  %v267_v29 = vrot.slane %v1536_v13, 1  ;;  %v744_v32 = vrot.slane %v1529_v11, 3 }
  0x11   :  { %1329 = vmatmul.mubr.msk.f32.gmra.mrb[2].mxu0 %vm47_vm0, %v514_v45  ;;  %1267 = vmatprep.mubr.msk.f32.mxu1 %vm47_vm0, %v1580_v30  ;;  %v539_v26 = vsel %vm504_vm1, %v536_v10, %v538_v17  ;;  %v542_v33 = vsel %vm504_vm1, %v540_v20, %v541_v21  ;;  %v745_v34 = vrot.slane %v1536_v13, 3  ;;  %v269_v35 = vrot.slane %v1549_v18, 1 }
  0x12   :  { %1331 = vmatprep.mubr.msk.f32.mxu0 %vm47_vm0, %v517_v48  ;;  %1396 = vmatpush3.bf16.msra.mxu1 %v1393_v44  ;;  %v747_v36 = vrot.slane %v1549_v18, 3  ;;  %v271_v11 = vrot.slane %v1561_v23, 1  ;;  %v544_v37 = vsel %vm504_vm1, %v541_v21, %v543_v27  ;;  %v268_v13 = vsel %vm265_vm2, %v266_v25, %v267_v29 }
  0x13   :  { %1412 = vmatpush3.bf16.msra.mxu0 %v1409_v47  ;;  %v272_v38 = vrot.slane %v1566_v24, 1  ;;  %v749_v40 = vrot.slane %v1561_v23, 3  ;;  %v746_v41 = vsel %vm743_vm3, %v744_v32, %v745_v34  ;;  %v750_v18 = vrot.slane %v1566_v24, 3 }
  0x14   :  { %1268 = vmatmul.mubr.msk.f32.gmra.mrb[4].mxu1 %vm47_vm0, %v1585_v31  ;;  %v276_v44 = vrot.slane %v1580_v30, 1  ;;  %v270_v45 = vsel %vm265_vm2, %v267_v29, %v269_v35  ;;  %v274_v46 = vrot.slane %v1573_v28, 1  ;;  %v748_v23 = vsel %vm743_vm3, %v745_v34, %v747_v36 }
  0x15   :  { %1332 = vmatmul.mubr.msk.f32.gmra.mrb[4].mxu0 %vm47_vm0, %v519_v54  ;;  %1270 = vmatprep.mubr.msk.f32.mxu1 %vm47_vm0, %v1614_v42  ;;  %v273_v47 = vsel %vm265_vm2, %v271_v11, %v272_v38  ;;  %v752_v24 = vrot.slane %v1573_v28, 3  ;;  %v277_v48 = vrot.slane %v1585_v31, 1  ;;  %v754_v49 = vrot.slane %v1580_v30, 3 }
  0x16   :  { %1334 = vmatprep.mubr.msk.f32.mxu0 %vm47_vm0, %v522_v56  ;;  %v751_v50 = vsel %vm743_vm3, %v749_v40, %v750_v18  ;;  %v755_v54 = vrot.slane %v1585_v31, 3  ;;  %v281_v55 = vrot.slane %v1614_v42, 1  ;;  %v275_v56 = vsel %vm265_vm2, %v272_v38, %v274_v46 }
  0x17   :  { %v279_v28 = vrot.slane %v1601_v39, 1  ;;  %v753_v30 = vsel %vm743_vm3, %v750_v18, %v752_v24  ;;  %v278_v57 = vsel %vm265_vm2, %v276_v44, %v277_v48  ;;  %v757_v31 = vrot.slane %v1601_v39, 3  ;;  %v1878_v24 = vld [vmem:[%s1916_s3] sm:$0xff] }
  0x18   :  { %1271 = vmatmul.mubr.msk.f32.gmra.mrb[6].mxu1 %vm47_vm0, %v1619_v43  ;;  %v282_v58 = vrot.slane %v1619_v43, 1  ;;  %v756_v63 = vsel %vm743_vm3, %v754_v49, %v755_v54  ;;  %v286_v1 = vrot.slane %v1640_v52, 1  ;;  %v284_v39 = vrot.slane %v1633_v51, 1 }
  0x19   :  { %1335 = vmatmul.mubr.msk.f32.gmra.mrb[6].mxu0 %vm47_vm0, %v524_v62  ;;  %1273 = vmatprep.mubr.msk.f32.mxu1 %vm47_vm0, %v1640_v52  ;;  %v759_v62 = vrot.slane %v1614_v42, 3  ;;  %v280_v2 = vsel %vm265_vm2, %v277_v48, %v279_v28  ;;  %v758_v42 = vsel %vm743_vm3, %v755_v54, %v757_v31  ;;  %v287_v7 = vrot.slane %v1645_v53, 1 }
  0x1a   :  { %1337 = vmatprep.mubr.msk.f32.mxu0 %vm47_vm0, %v527_v0  ;;  %v760_v0 = vrot.slane %v1619_v43, 3  ;;  %v762_v43 = vrot.slane %v1633_v51, 3  ;;  %v765_v10 = vrot.slane %v1645_v53, 3  ;;  %v285_v17 = vsel %vm265_vm2, %v282_v58, %v284_v39 }
  0x1b   :  { %v289_v51 = vrot.slane %v1659_v59, 1  ;;  %v292_v20 = vrot.slane %v1671_v61, 1  ;;  %v769_v21 = vrot.slane %v1666_v60, 3  ;;  %v296_v27 = vrot.slane %v1692_v4, 1 }
  0x1c   :  { %1274 = vmatmul.mubr.msk.f32.gmra.mrb[8].mxu1 %vm47_vm0, %v1645_v53  ;;  %v761_v9 = vsel %vm743_vm3, %v759_v62, %v760_v0  ;;  %v767_v53 = vrot.slane %v1659_v59, 3  ;;  %v294_v59 = vrot.slane %v1685_v3, 1  ;;  %v774_v34 = vrot.slane %v1692_v4, 3 }
  0x1d   :  { %1338 = vmatmul.mubr.msk.f32.gmra.mrb[8].mxu0 %vm47_vm0, %v529_v6  ;;  %1276 = vmatprep.mubr.msk.f32.mxu1 %vm47_vm0, %v1666_v60  ;;  %v283_v6 = vsel %vm265_vm2, %v281_v55, %v282_v58  ;;  %v290_v29 = vsel %vm265_vm2, %v287_v7, %v289_v51  ;;  %v775_v36 = vrot.slane %v1697_v5, 3  ;;  %v301_v11 = vrot.slane %v1718_v14, 1 }
  0x1e   :  { %1340 = vmatprep.mubr.msk.f32.mxu0 %vm47_vm0, %v532_v8  ;;  %v764_v8 = vrot.slane %v1640_v52, 3  ;;  %v763_v52 = vsel %vm743_vm3, %v760_v0, %v762_v43  ;;  %v302_v38 = vrot.slane %v1723_v15, 1  ;;  %v779_v40 = vrot.slane %v1718_v14, 3 }
  0x1f   :  { %v780_v18 = vrot.slane %v1723_v15, 3  ;;  %v782_v46 = vrot.slane %v1737_v22, 3 }
  0x20   :  { %1277 = vmatmul.mubr.msk.f32.gmra.mrb[10].mxu1 %vm47_vm0, %v1671_v61  ;;  %v766_v25 = vsel %vm743_vm3, %v764_v8, %v765_v10 }
  0x21   :  { %1341 = vmatmul.mubr.msk.f32.gmra.mrb[10].mxu0 %vm47_vm0, %v534_v16  ;;  %1279 = vmatprep.mubr.msk.f32.mxu1 %vm47_vm0, %v1692_v4  ;;  %v291_v16 = vrot.slane %v1666_v60, 1  ;;  %v768_v60 = vsel %vm743_vm3, %v765_v10, %v767_v53 }
  0x22   :  { %1343 = vmatprep.mubr.msk.f32.mxu0 %vm47_vm0, %v537_v19  ;;  %v288_v19 = vsel %vm265_vm2, %v286_v1, %v287_v7 }
  0x23   :  { %v293_v32 = vsel %vm265_vm2, %v291_v16, %v292_v20 }
  0x24   :  { %1280 = vmatmul.mubr.msk.f32.gmra.mrb[12].mxu1 %vm47_vm0, %v1697_v5 }
  0x25   :  { %1344 = vmatmul.mubr.msk.f32.gmra.mrb[12].mxu0 %vm47_vm0, %v539_v26  ;;  %1282 = vmatprep.mubr.msk.f32.mxu1 %vm47_vm0, %v1718_v14  ;;  %v770_v26 = vrot.slane %v1671_v61, 3  ;;  %v772_v61 = vrot.slane %v1685_v3, 3  ;;  %v299_v3 = vrot.slane %v1711_v12, 1  ;;  %v303_v14 = vsel %vm265_vm2, %v301_v11, %v302_v38 }
  0x26   :  { %1346 = vmatprep.mubr.msk.f32.mxu0 %vm47_vm0, %v542_v33  ;;  %v297_v33 = vrot.slane %v1697_v5, 1  ;;  %v777_v5 = vrot.slane %v1711_v12, 3 }
  0x27   :  { %v771_v35 = vsel %vm743_vm3, %v769_v21, %v770_v26  ;;  %v773_v4 = vsel %vm743_vm3, %v770_v26, %v772_v61 }
  0x28   :  { %1283 = vmatmul.mubr.msk.f32.gmra.mrb[14].mxu1 %vm47_vm0, %v1723_v15  ;;  %v300_v44 = vsel %vm265_vm2, %v297_v33, %v299_v3  ;;  %v778_v12 = vsel %vm743_vm3, %v775_v36, %v777_v5  ;;  %v781_v15 = vsel %vm743_vm3, %v779_v40, %v780_v18 }
  0x29   :  { %1347 = vmatmul.mubr.msk.f32.gmra.mrb[14].mxu0 %vm47_vm0, %v544_v37  ;;  %1293 = vmatprep.mubr.msk.f32.mxu1 %vm47_vm0, %v268_v13  ;;  %v295_v37 = vsel %vm265_vm2, %v292_v20, %v294_v59  ;;  %v298_v13 = vsel %vm265_vm2, %v296_v27, %v297_v33 }
  0x2a   :  { %1357 = vmatprep.mubr.msk.f32.mxu0 %vm47_vm0, %v746_v41  ;;  %v776_v41 = vsel %vm743_vm3, %v774_v34, %v775_v36 }
  0x2c   :  { %1294 = vmatmul.mubr.msk.f32.vlgmr.msra.gmra.mrb[0].mxu1 %vm47_vm0, %v270_v45  ;;  %v304_v45 = vrot.slane %v1737_v22, 1  ;;  %v1873_v22 = vld [vmem:[%s1916_s3 + $0x8] sm:$0xff] }
  0x2d   :  { %1358 = vmatmul.mubr.msk.f32.vlgmr.msra.gmra.mrb[0].mxu0 %vm47_vm0, %v748_v23  ;;  %1296 = vmatprep.mubr.msk.f32.mxu1 %vm47_vm0, %v273_v47  ;;  %v783_v47 = vsel %vm743_vm3, %v780_v18, %v782_v46 }
  0x2e   :  { %1360 = vmatprep.mubr.msk.f32.mxu0 %vm47_vm0, %v751_v50  ;;  %v305_v23 = vsel %vm265_vm2, %v302_v38, %v304_v45  ;;  %v1893_v45 = vld [vmem:[%s1917_s2] ss:$0 sm:$0xff] }
  0x30   :  { %1297 = vmatmul.mubr.msk.f32.gmra.mrb[2].mxu1 %vm47_vm0, %v275_v56 }
  0x31   :  { %1361 = vmatmul.mubr.msk.f32.gmra.mrb[2].mxu0 %vm47_vm0, %v753_v30  ;;  %1299 = vmatprep.mubr.msk.f32.mxu1 %vm47_vm0, %v278_v57 }
  0x32   :  { %1363 = vmatprep.mubr.msk.f32.mxu0 %vm47_vm0, %v756_v63 }
  0x34   :  { %1300 = vmatmul.mubr.msk.f32.gmra.mrb[4].mxu1 %vm47_vm0, %v280_v2 }
  0x35   :  { %1364 = vmatmul.mubr.msk.f32.gmra.mrb[4].mxu0 %vm47_vm0, %v758_v42  ;;  %1302 = vmatprep.mubr.msk.f32.mxu1 %vm47_vm0, %v283_v6 }
  0x36   :  { %1366 = vmatprep.mubr.msk.f32.mxu0 %vm47_vm0, %v761_v9 }
  0x38   :  { %1303 = vmatmul.mubr.msk.f32.gmra.mrb[6].mxu1 %vm47_vm0, %v285_v17 }
  0x39   :  { %1367 = vmatmul.mubr.msk.f32.gmra.mrb[6].mxu0 %vm47_vm0, %v763_v52  ;;  %1305 = vmatprep.mubr.msk.f32.mxu1 %vm47_vm0, %v288_v19 }
  0x3a   :  { %1369 = vmatprep.mubr.msk.f32.mxu0 %vm47_vm0, %v766_v25 }
  0x3c   :  { %1306 = vmatmul.mubr.msk.f32.gmra.mrb[8].mxu1 %vm47_vm0, %v290_v29 }
  0x3d   :  { %1370 = vmatmul.mubr.msk.f32.gmra.mrb[8].mxu0 %vm47_vm0, %v768_v60  ;;  %1308 = vmatprep.mubr.msk.f32.mxu1 %vm47_vm0, %v293_v32 }
  0x3e   :  { %1372 = vmatprep.mubr.msk.f32.mxu0 %vm47_vm0, %v771_v35 }
  0x40   :  { %1309 = vmatmul.mubr.msk.f32.gmra.mrb[10].mxu1 %vm47_vm0, %v295_v37 }
  0x41   :  { %1373 = vmatmul.mubr.msk.f32.gmra.mrb[10].mxu0 %vm47_vm0, %v773_v4  ;;  %1311 = vmatprep.mubr.msk.f32.mxu1 %vm47_vm0, %v298_v13 }
  0x42   :  { %1375 = vmatprep.mubr.msk.f32.mxu0 %vm47_vm0, %v776_v41 }
  0x44   :  { %1312 = vmatmul.mubr.msk.f32.gmra.mrb[12].mxu1 %vm47_vm0, %v300_v44 }
  0x45   :  { %1376 = vmatmul.mubr.msk.f32.gmra.mrb[12].mxu0 %vm47_vm0, %v778_v12  ;;  %1314 = vmatprep.mubr.msk.f32.mxu1 %vm47_vm0, %v303_v14 }
  0x46   :  { %1378 = vmatprep.mubr.msk.f32.mxu0 %vm47_vm0, %v781_v15 }
  0x48   :  { %1315 = vmatmul.mubr.msk.f32.gmra.mrb[14].mxu1 %vm47_vm0, %v305_v23 }
  0x49   :  { %1379 = vmatmul.mubr.msk.f32.gmra.mrb[14].mxu0 %vm47_vm0, %v783_v47 }
  0xff   :  { %v1295_v48 = vpop.f32.mrb[0].mxu1 }
 0x100   :  { %v1413_v49 = vadd.f32 %v1295_v48, %v1873_v22  ;;  %v1359_v50 = vpop.f32.mrb[0].mxu0  ;;  %v409_v54 = vpop.f32.mrb[1].mxu1 }
 0x101   :  { %v1415_v55 = vadd.f32 %v409_v54, %v1878_v24  ;;  %v887_v56 = vpop.f32.mrb[1].mxu0 }
 0x102   :  { %v1414_v28 = vadd.f32 %v1413_v49, %v1359_v50 }
 0x103   :  { %v1416_v30 = vadd.f32 %v1415_v55, %v887_v56  ;;  %v1298_v57 = vpop.f32.mrb[2].mxu1 }
 0x104   :  { %v1417_v31 = vadd.f32 %v1298_v57, %v1873_v22  ;;  %v1362_v58 = vpop.f32.mrb[2].mxu0  ;;  %v419_v62 = vpop.f32.mrb[3].mxu1 }
 0x105   :  { %v982_v63 = vmax.f32 %v1416_v30, %v1414_v28  ;;  %v1419_v0 = vadd.f32 %v419_v62, %v1878_v24  ;;  %v897_v1 = vpop.f32.mrb[3].mxu0 }
 0x106   :  { %v1418_v2 = vadd.f32 %v1417_v31, %v1362_v58 }
 0x107   :  { %v983_v39 = vrot.slane %v982_v63, 4  ;;  %v1420_v42 = vadd.f32 %v1419_v0, %v897_v1  ;;  %v1301_v6 = vpop.f32.mrb[4].mxu1 }
 0x108   :  { %v1421_v43 = vadd.f32 %v1301_v6, %v1873_v22  ;;  %v1365_v7 = vpop.f32.mrb[4].mxu0  ;;  %v429_v8 = vpop.f32.mrb[5].mxu1 }
 0x109   :  { %v984_v9 = vmax.f32 %v982_v63, %v983_v39  ;;  %v989_v10 = vmax.f32 %v1420_v42, %v1418_v2  ;;  %v1423_v16 = vadd.f32 %v429_v8, %v1878_v24  ;;  %v907_v17 = vpop.f32.mrb[5].mxu0 }
 0x10a   :  { %v1422_v51 = vadd.f32 %v1421_v43, %v1365_v7 }
 0x10b   :  { %v985_v52 = vrot.slane %v984_v9, 2  ;;  %v990_v19 = vrot.slane %v989_v10, 4  ;;  %v1424_v53 = vadd.f32 %v1423_v16, %v907_v17  ;;  %v1304_v20 = vpop.f32.mrb[6].mxu1 }
 0x10c   :  { %v1425_v21 = vadd.f32 %v1304_v20, %v1873_v22  ;;  %v1368_v25 = vpop.f32.mrb[6].mxu0  ;;  %v439_v26 = vpop.f32.mrb[7].mxu1 }
 0x10d   :  { %v986_v27 = vmax.f32 %v984_v9, %v985_v52  ;;  %v991_v29 = vmax.f32 %v989_v10, %v990_v19  ;;  %v996_v59 = vmax.f32 %v1424_v53, %v1422_v51  ;;  %v1427_v60 = vadd.f32 %v439_v26, %v1878_v24  ;;  %v917_v32 = vpop.f32.mrb[7].mxu0 }
 0x10e   :  { %v1426_v61 = vadd.f32 %v1425_v21, %v1368_v25 }
 0x10f   :  { %v987_v33 = vrot.slane %v986_v27, 1  ;;  %v992_v34 = vrot.slane %v991_v29, 2  ;;  %v997_v35 = vrot.slane %v996_v59, 4  ;;  %v1428_v36 = vadd.f32 %v1427_v60, %v917_v32  ;;  %v1307_v11 = vpop.f32.mrb[8].mxu1 }
 0x110   :  { %v1429_v37 = vadd.f32 %v1307_v11, %v1873_v22  ;;  %v1371_v3 = vpop.f32.mrb[8].mxu0  ;;  %v449_v4 = vpop.f32.mrb[9].mxu1 }
 0x111   :  { %v993_v13 = vmax.f32 %v991_v29, %v992_v34  ;;  %v998_v5 = vmax.f32 %v996_v59, %v997_v35  ;;  %v1003_v38 = vmax.f32 %v1428_v36, %v1426_v61  ;;  %v927_v40 = vpop.f32.mrb[9].mxu0  ;;  %v988_v41 = vmax.f32 %v986_v27, %v987_v33 }
 0x112   :  { %v1430_v18 = vadd.f32 %v1429_v37, %v1371_v3  ;;  %v1431_v44 = vadd.f32 %v449_v4, %v1878_v24 }
 0x113   :  { %v994_v12 = vrot.slane %v993_v13, 1  ;;  %v999_v14 = vrot.slane %v998_v5, 2  ;;  %v1004_v46 = vrot.slane %v1003_v38, 4  ;;  %v1310_v15 = vpop.f32.mrb[10].mxu1  ;;  %v1045_v28 = vadd.f32 %v1893_v45, %v988_v41 }
 0x114   :  { %v1432_v23 = vadd.f32 %v1431_v44, %v927_v40  ;;  %v1433_v47 = vadd.f32 %v1310_v15, %v1873_v22  ;;  %v1374_v48 = vpop.f32.mrb[10].mxu0  ;;  %v459_v49 = vpop.f32.mrb[11].mxu1 }
 0x115   :  { %v995_v50 = vmax.f32 %v993_v13, %v994_v12  ;;  %v1000_v54 = vmax.f32 %v998_v5, %v999_v14  ;;  %v1005_v55 = vmax.f32 %v1003_v38, %v1004_v46  ;;  %v937_v56 = vpop.f32.mrb[11].mxu0  ;;  %v1435_v31 = vadd.f32 %v459_v49, %v1878_v24 }
 0x116   :  { %v1010_v30 = vmax.f32 %v1432_v23, %v1430_v18  ;;  %v1434_v57 = vadd.f32 %v1433_v47, %v1374_v48  ;;  %v1053_v16 = vmax.f32 %v1045_v28, 0.0 }
 0x117   :  { %v1046_v58 = vadd.f32 %v1893_v45, %v995_v50  ;;  %v1001_v62 = vrot.slane %v1000_v54, 1  ;;  %v1006_v63 = vrot.slane %v1005_v55, 2  ;;  %v1313_v0 = vpop.f32.mrb[12].mxu1  ;;  %v1436_v2 = vadd.f32 %v1435_v31, %v937_v56 }
 0x118   :  { %v1011_v1 = vrot.slane %v1010_v30, 4  ;;  %v1437_v39 = vadd.f32 %v1313_v0, %v1873_v22  ;;  %v1377_v42 = vpop.f32.mrb[12].mxu0  ;;  %v469_v6 = vpop.f32.mrb[13].mxu1 }
 0x119   :  { %v1054_v43 = vmax.f32 %v1046_v58, 0.0  ;;  %v1002_v7 = vmax.f32 %v1000_v54, %v1001_v62  ;;  %v1007_v8 = vmax.f32 %v1005_v55, %v1006_v63  ;;  %v1439_v9 = vadd.f32 %v469_v6, %v1878_v24  ;;  %v947_v10 = vpop.f32.mrb[13].mxu0 }
 0x11a   :  { %v1012_v17 = vmax.f32 %v1010_v30, %v1011_v1  ;;  %v1017_v51 = vmax.f32 %v1436_v2, %v1434_v57  ;;  %v1438_v52 = vadd.f32 %v1437_v39, %v1377_v42 }
 0x11b   :  { %v1069_v19 = vrot.slane %v1054_v43, 7  ;;  %v1047_v53 = vadd.f32 %v1893_v45, %v1002_v7  ;;  %v1008_v20 = vrot.slane %v1007_v8, 1  ;;  %v1440_v21 = vadd.f32 %v1439_v9, %v947_v10  ;;  %v1316_v25 = vpop.f32.mrb[14].mxu1 }
 0x11c   :  { %v1013_v26 = vrot.slane %v1012_v17, 2  ;;  %v1018_v27 = vrot.slane %v1017_v51, 4  ;;  %v1441_v29 = vadd.f32 %v1316_v25, %v1873_v22  ;;  %v1380_v59 = vpop.f32.mrb[14].mxu0  ;;  %v479_v60 = vpop.f32.mrb[15].mxu1 }
 0x11d   :  { %v1071_v32 = vsel %vm1070_vm4, %v1069_v19, %v1053_v16  ;;  %v1055_v61 = vmax.f32 %v1047_v53, 0.0  ;;  %v1009_v33 = vmax.f32 %v1007_v8, %v1008_v20  ;;  %v1024_v34 = vmax.f32 %v1440_v21, %v1438_v52  ;;  %v957_v35 = vpop.f32.mrb[15].mxu0 }
 0x11e   :  { %v1014_v36 = vmax.f32 %v1012_v17, %v1013_v26  ;;  %v1019_v11 = vmax.f32 %v1017_v51, %v1018_v27  ;;  %v1442_v37 = vadd.f32 %v1441_v29, %v1380_v59  ;;  %v1443_v3 = vadd.f32 %v479_v60, %v1878_v24 }
 0x11f   :  { %v1072_v4 = vrot.slane %v1055_v61, 6  ;;  %v1048_v13 = vadd.f32 %v1893_v45, %v1009_v33  ;;  %v1025_v5 = vrot.slane %v1024_v34, 4 }
 0x120   :  { %v1015_v38 = vrot.slane %v1014_v36, 1  ;;  %v1020_v40 = vrot.slane %v1019_v11, 2  ;;  %v1444_v22 = vadd.f32 %v1443_v3, %v957_v35 }
 0x121   :  { %v1074_v41 = vsel %vm1073_vm5, %v1072_v4, %v1071_v32  ;;  %v1056_v18 = vmax.f32 %v1048_v13, 0.0  ;;  %v1026_v44 = vmax.f32 %v1024_v34, %v1025_v5 }
 0x122   :  { %v1016_v12 = vmax.f32 %v1014_v36, %v1015_v38  ;;  %v1021_v14 = vmax.f32 %v1019_v11, %v1020_v40  ;;  %v1031_v46 = vmax.f32 %v1444_v22, %v1442_v37 }
 0x123   :  { %v1075_v15 = vrot.slane %v1056_v18, 5  ;;  %v1027_v23 = vrot.slane %v1026_v44, 2 }
 0x124   :  { %v1049_v47 = vadd.f32 %v1893_v45, %v1016_v12  ;;  %v1022_v24 = vrot.slane %v1021_v14, 1  ;;  %v1032_v48 = vrot.slane %v1031_v46, 4 }
 0x125   :  { %v1077_v49 = vsel %vm1076_vm6, %v1075_v15, %v1074_v41  ;;  %v1028_v50 = vmax.f32 %v1026_v44, %v1027_v23 }
 0x126   :  { %v1057_v54 = vmax.f32 %v1049_v47, 0.0  ;;  %v1023_v55 = vmax.f32 %v1021_v14, %v1022_v24  ;;  %v1033_v56 = vmax.f32 %v1031_v46, %v1032_v48 }
 0x127   :  { %v1029_v28 = vrot.slane %v1028_v50, 1 }
 0x128   :  { %v1078_v30 = vrot.slane %v1057_v54, 4  ;;  %v1050_v57 = vadd.f32 %v1893_v45, %v1023_v55  ;;  %v1034_v31 = vrot.slane %v1033_v56, 2 }
 0x129   :  { %v1030_v58 = vmax.f32 %v1028_v50, %v1029_v28 }
 0x12a   :  { %v1080_v62 = vsel %vm1079_vm7, %v1078_v30, %v1077_v49  ;;  %v1058_v63 = vmax.f32 %v1050_v57, 0.0  ;;  %v1035_v0 = vmax.f32 %v1033_v56, %v1034_v31 }
 0x12b   :  { %v1051_v1 = vadd.f32 %v1893_v45, %v1030_v58 }
 0x12c   :  { %v1081_v2 = vrot.slane %v1058_v63, 3  ;;  %v1036_v39 = vrot.slane %v1035_v0, 1 }
 0x12d   :  { %v1059_v42 = vmax.f32 %v1051_v1, 0.0 }
 0x12e   :  { %v1083_v6 = vsel %vm1082_vm8, %v1081_v2, %v1080_v62  ;;  %v1037_v43 = vmax.f32 %v1035_v0, %v1036_v39 }
 0x12f   :  { %v1084_v7 = vrot.slane %v1059_v42, 2 }
 0x130   :  { %v1052_v8 = vadd.f32 %v1893_v45, %v1037_v43 }
 0x131   :  { %v1086_v9 = vsel %vm1085_vm9, %v1084_v7, %v1083_v6 }
 0x132   :  { %v1060_v10 = vmax.f32 %v1052_v8, 0.0 }
 0x134   :  { %v1087_v16 = vrot.slane %v1060_v10, 1 }
 0x136   :  { %v1089_v17 = vsel %vm1088_vm10, %v1087_v16, %v1086_v9 }
 0x137   :  { %1091 = vst [vmem:[%s1918_s4] sm:$0xff] %v1089_v17 }

</bundles_post_ra>
